<compile_context>
chip_gen: v6e
topology: v6e:2x2x1
jax: 0.10.0
libtpu: 0.0.40
codegen_flags: <defaults>
</compile_context>

<pallas_src>
import jax
import jax.numpy as jnp
from jax.experimental import pallas as pl
from jax.experimental.pallas import tpu as pltpu


def _round_up(n: int, m: int) -> int:
    return ((n + m - 1) // m) * m


def _mlp_kernel(x_ref, w12_ref, b12_ref, w3_ref, b3_ref, o_ref):
    # Fused layers 1+2 (layer-1 activation is 'linear' -> identity, so
    # (x@W1+b1)@W2+b2 == x@(W1@W2) + (b1@W2+b2)).  bf16 operands, f32 accumulate.
    x = x_ref[...].astype(jnp.bfloat16)               # in-kernel cast (VPU)
    h = jnp.dot(x, w12_ref[...], preferred_element_type=jnp.float32)
    h = jnp.maximum(h + b12_ref[...], 0.0)            # layer-2 ReLU (f32 epilogue)

    # Layer 3: Linear(k2 -> out) + ReLU
    h = jnp.dot(h.astype(jnp.bfloat16), w3_ref[...],
                preferred_element_type=jnp.float32)
    h = jnp.maximum(h + b3_ref[...], 0.0)

    o_ref[...] = h.astype(o_ref.dtype)


def prepare_params(params):
    """One-time parameter prep (hoisted out of the per-call wrapper).

    params: (w1,b1,w2,b2,w3,b3), w_i [in,out] f32, b_i [1,out] f32.
    Returns (w12_bf16, b12_f32, w3_bf16, b3_f32) with layers 1+2 fused.
    """
    w1, b1, w2, b2, w3, b3 = params
    w12 = jnp.dot(w1, w2, precision=jax.lax.Precision.HIGHEST)      # f32 product
    b12 = jnp.dot(b1, w2, precision=jax.lax.Precision.HIGHEST) + b2  # f32 bias
    return (w12.astype(jnp.bfloat16), b12,
            w3.astype(jnp.bfloat16), b3)


def mlp_forward(x, prepared_params, *, block_rows=4096, out_dtype=jnp.float32):
    """x: [batch, input_size] f32. prepared_params from prepare_params()."""
    w12, b12, w3, b3 = prepared_params
    batch, in_dim = x.shape
    k_mid = w12.shape[1]          # 64
    out_dim = w3.shape[1]         # 32

    # --- batch tiling: 128-row aligned tiles; cap tile at ~half the batch so the
    # 'parallel' grid has >= 2 steps (keeps both v7x TensorCores busy), then pad batch
    # to a tile multiple (padded rows are sliced off after the call).
    batch_aligned = _round_up(max(batch, 1), 128)
    half_tile = _round_up(max(batch_aligned // 2, 128), 128)
    tile = min(block_rows, half_tile)
    batch_p = _round_up(batch, tile)
    if batch_p != batch:
        x = jnp.pad(x, ((0, batch_p - batch), (0, 0)))
    grid = (batch_p // tile,)

    const2d = lambda shape: pl.BlockSpec(shape, lambda i: (0, 0))  # VMEM-resident params

    flops = 2 * batch_p * (in_dim * k_mid + k_mid * out_dim)
    out_bytes_per_elem = 2 if out_dtype == jnp.bfloat16 else 4
    bytes_accessed = (
        batch_p * in_dim * 4 + batch_p * out_dim * out_bytes_per_elem   # x (f32) + out
        + (in_dim * k_mid + k_mid * out_dim) * 2                        # weights (bf16)
        + (k_mid + out_dim) * 4                                         # biases (f32)
    )

    # Actual footprint (double-buffered x/out tiles + small weights + temporaries) is a
    # few MiB; stay under v5e's 16 MiB default scoped VMEM.
    vmem_limit = int(min(16 * 1024 * 1024,
                         2 * tile * (in_dim + out_dim) * 4 + 8 * 1024 * 1024))

    out_padded = pl.pallas_call(
        _mlp_kernel,
        out_shape=jax.ShapeDtypeStruct((batch_p, out_dim), out_dtype),
        grid=grid,
        in_specs=[
            pl.BlockSpec((tile, in_dim), lambda i: (i, 0)),    # x tile, pipelined
            const2d(w12.shape), const2d(b12.shape),
            const2d(w3.shape), const2d(b3.shape),
        ],
        out_specs=pl.BlockSpec((tile, out_dim), lambda i: (i, 0)),   # un-padded, lane = full dim
        compiler_params=pltpu.CompilerParams(
            dimension_semantics=("parallel",),                 # v7x: both TCs split the batch grid
            vmem_limit_bytes=vmem_limit,
        ),
        cost_estimate=pl.CostEstimate(
            flops=int(flops), transcendentals=0, bytes_accessed=int(bytes_accessed)),
    )(x, w12, b12, w3, b3)

    return out_padded if batch_p == batch else out_padded[:batch]


def init_params(key, input_size, kernel_size):
    """Deterministic PyTorch-style (uniform +-1/sqrt(fan_in)) init. Weights stored [in, out]."""
    params = []
    in_dim = input_size
    for out_dim in kernel_size:
        key, kw, kb = jax.random.split(key, 3)
        bound = 1.0 / jnp.sqrt(in_dim)
        w = jax.random.uniform(kw, (in_dim, out_dim), jnp.float32, -bound, bound)
        b = jax.random.uniform(kb, (1, out_dim), jnp.float32, -bound, bound)
        params.extend([w, b])
        in_dim = out_dim
    return tuple(params)


def reference_forward(x, params):
    """Pure-JAX f32 reference mirroring the PyTorch forward exactly."""
    w1, b1, w2, b2, w3, b3 = params
    dot = lambda a, b: jnp.dot(a, b, precision=jax.lax.Precision.HIGHEST)
    h = dot(x, w1) + b1                       # activation 'linear' -> identity
    h = jnp.maximum(dot(h, w2) + b2, 0.0)     # ReLU
    h = jnp.maximum(dot(h, w3) + b3, 0.0)     # ReLU
    return h


if __name__ == "__main__":
    # Module configuration (consistent with the PyTorch __init__ arguments)
    input_size = 32
    kernel_size = [128, 64, 32]           # MLP_1, MLP_2, MLP_3 output widths
    # activation_fn = ['linear', 'ReLU', 'ReLU']; batch_norm = all False; bias = all True
    batch = 8                             # NOTE: at this size the kernel is overhead-bound;
                                          # it pays off once batch spans many 128-row tiles.

    key = jax.random.PRNGKey(0)
    key, kx = jax.random.split(key)
    x = jax.random.normal(kx, (batch, input_size), jnp.float32)

    params = init_params(key, input_size, kernel_size)
    prepared = prepare_params(params)     # hoisted one-time weight prep (fusion + bf16)

    # forward([x]) in PyTorch takes the first element of the list -> plain x here
    out = mlp_forward(x, prepared)
    out = jax.block_until_ready(out)

    ref = reference_forward(x, params)
    assert out.shape == (batch, kernel_size[-1])
    # bf16 matmul operands (f32 accumulate) vs the exact f32 reference -> ~1e-2 tolerance
    assert jnp.allclose(out, ref, atol=2e-2, rtol=2e-2), "mismatch vs pure-JAX reference"

    print("KERNEL_OK")
</pallas_src>

<mosaic_0001>
module attributes {stable_mosaic.version = 11 : i64} {
  func.func @_mlp_kernel(%arg0: i32, %arg1: memref<128x32xf32, #tpu.memory_space<vmem>>, %arg2: memref<32x64xbf16, #tpu.memory_space<vmem>>, %arg3: memref<1x64xf32, #tpu.memory_space<vmem>>, %arg4: memref<64x32xbf16, #tpu.memory_space<vmem>>, %arg5: memref<1x32xf32, #tpu.memory_space<vmem>>, %arg6: memref<128x32xf32, #tpu.memory_space<vmem>>) attributes {dimension_semantics = [#tpu.dimension_semantics<parallel>], iteration_bounds = array<i64: 1>, scalar_prefetch = 0 : i64, scratch_operands = 0 : i64, tpu.core_type = #tpu.core_type<tc>, window_params = [{transform_indices = @transform_0, window_bounds = array<i64: 128, 32>}, {pipeline_mode = #tpu.pipeline_mode<synchronous>, transform_indices = @transform_1, window_bounds = array<i64: 32, 64>}, {pipeline_mode = #tpu.pipeline_mode<synchronous>, transform_indices = @transform_2, window_bounds = array<i64: 1, 64>}, {pipeline_mode = #tpu.pipeline_mode<synchronous>, transform_indices = @transform_3, window_bounds = array<i64: 64, 32>}, {pipeline_mode = #tpu.pipeline_mode<synchronous>, transform_indices = @transform_4, window_bounds = array<i64: 1, 32>}, {transform_indices = @transform_5, window_bounds = array<i64: 128, 32>}]} {
    %c0 = arith.constant 0 : index
    %c0_0 = arith.constant 0 : index
    %0 = vector.load %arg1[%c0, %c0_0] : memref<128x32xf32, #tpu.memory_space<vmem>>, vector<128x32xf32>
    %1 = arith.truncf %0 : vector<128x32xf32> to vector<128x32xbf16>
    %c0_1 = arith.constant 0 : index
    %c0_2 = arith.constant 0 : index
    %2 = vector.load %arg2[%c0_1, %c0_2] : memref<32x64xbf16, #tpu.memory_space<vmem>>, vector<32x64xbf16>
    %cst = arith.constant dense<0.000000e+00> : vector<128x64xf32>
    %3 = tpu.matmul %1, %2, %cst {dimension_numbers = #tpu.dot_dimension_numbers<[1], [0], [0], [1], [0, 0, 1, 1], [], []>} : vector<128x32xbf16>, vector<32x64xbf16>, vector<128x64xf32> -> vector<128x64xf32>
    %c0_3 = arith.constant 0 : index
    %c0_4 = arith.constant 0 : index
    %4 = vector.load %arg3[%c0_3, %c0_4] : memref<1x64xf32, #tpu.memory_space<vmem>>, vector<1x64xf32>
    %5 = vector.broadcast %4 : vector<1x64xf32> to vector<128x64xf32>
    %6 = arith.addf %3, %5 : vector<128x64xf32>
    %cst_5 = arith.constant 0.000000e+00 : f32
    %7 = vector.broadcast %cst_5 : f32 to vector<128x64xf32>
    %8 = arith.maximumf %6, %7 : vector<128x64xf32>
    %9 = arith.truncf %8 : vector<128x64xf32> to vector<128x64xbf16>
    %c0_6 = arith.constant 0 : index
    %c0_7 = arith.constant 0 : index
    %10 = vector.load %arg4[%c0_6, %c0_7] : memref<64x32xbf16, #tpu.memory_space<vmem>>, vector<64x32xbf16>
    %cst_8 = arith.constant dense<0.000000e+00> : vector<128x32xf32>
    %11 = tpu.matmul %9, %10, %cst_8 {dimension_numbers = #tpu.dot_dimension_numbers<[1], [0], [0], [1], [0, 0, 1, 1], [], []>} : vector<128x64xbf16>, vector<64x32xbf16>, vector<128x32xf32> -> vector<128x32xf32>
    %c0_9 = arith.constant 0 : index
    %c0_10 = arith.constant 0 : index
    %12 = vector.load %arg5[%c0_9, %c0_10] : memref<1x32xf32, #tpu.memory_space<vmem>>, vector<1x32xf32>
    %13 = vector.broadcast %12 : vector<1x32xf32> to vector<128x32xf32>
    %14 = arith.addf %11, %13 : vector<128x32xf32>
    %cst_11 = arith.constant 0.000000e+00 : f32
    %15 = vector.broadcast %cst_11 : f32 to vector<128x32xf32>
    %16 = arith.maximumf %14, %15 : vector<128x32xf32>
    %c0_12 = arith.constant 0 : index
    %c0_13 = arith.constant 0 : index
    %17 = vector.load %arg6[%c0_12, %c0_13] : memref<128x32xf32, #tpu.memory_space<vmem>>, vector<128x32xf32>
    tpu.vector_store %arg6[%c0_12, %c0_13], %16 {strides = array<i32>} : memref<128x32xf32, #tpu.memory_space<vmem>>, vector<128x32xf32>,
    return
  }
  func.func @transform_0(%arg0: i32) -> (i32, i32) {
    %c0_i32 = arith.constant 0 : i32
    %c0_i32_0 = arith.constant 0 : i32
    return %arg0, %c0_i32 : i32, i32
  }
  func.func @transform_1(%arg0: i32) -> (i32, i32) {
    %c0_i32 = arith.constant 0 : i32
    %c0_i32_0 = arith.constant 0 : i32
    %c0_i32_1 = arith.constant 0 : i32
    return %c0_i32, %c0_i32_0 : i32, i32
  }
  func.func @transform_2(%arg0: i32) -> (i32, i32) {
    %c0_i32 = arith.constant 0 : i32
    %c0_i32_0 = arith.constant 0 : i32
    %c0_i32_1 = arith.constant 0 : i32
    return %c0_i32, %c0_i32_0 : i32, i32
  }
  func.func @transform_3(%arg0: i32) -> (i32, i32) {
    %c0_i32 = arith.constant 0 : i32
    %c0_i32_0 = arith.constant 0 : i32
    %c0_i32_1 = arith.constant 0 : i32
    return %c0_i32, %c0_i32_0 : i32, i32
  }
  func.func @transform_4(%arg0: i32) -> (i32, i32) {
    %c0_i32 = arith.constant 0 : i32
    %c0_i32_0 = arith.constant 0 : i32
    %c0_i32_1 = arith.constant 0 : i32
    return %c0_i32, %c0_i32_0 : i32, i32
  }
  func.func @transform_5(%arg0: i32) -> (i32, i32) {
    %c0_i32 = arith.constant 0 : i32
    %c0_i32_0 = arith.constant 0 : i32
    return %arg0, %c0_i32 : i32, i32
  }
}

</mosaic_0001>

<bundles_post_ra>
// kernel: tpu_custom_call.1
= control target key start
LH: loop header
LB: loop body
LE: loop exit
PB: predicated region body
PF: predicated region fallthrough
CT: control target
= control target key end

     0   :  { %vm68_vm0 = vcmask 261120   ;;  %vm253_vm1 = vcmask 523264   ;;  %s689_s1 = inlined_call_operand.vmem [shape: bf16[32,64], index: 1, kind: input, shape index: {}]   ;;  %s690_s0 = inlined_call_operand.vmem [shape: f32[128,32], index: 0, kind: input, shape index: {}]   ;;  %s691_s3 = inlined_call_operand.vmem [shape: bf16[64,32], index: 3, kind: input, shape index: {}]   ;;  %s692_s2 = inlined_call_operand.vmem [shape: f32[1,64], index: 2, kind: input, shape index: {}]   ;;  %s693_s4 = inlined_call_operand.vmem [shape: f32[1,32], index: 4, kind: input, shape index: {}]   ;;  %s694_s5 = inlined_call_operand.vmem [shape: f32[128,32], index: 5, kind: output, shape index: {}]  }
   0x1   :  { %v501_v0 = vld [vmem:[%s689_s1 + $0x8] sm:$0xff]   ;;  %v502_v1 = vld [vmem:[%s689_s1] sm:$0xff]   ;;  %v23_v5 = vld [vmem:[%s690_s0 + $0x10] sm:$0xff] }
   0x2   :  { %457 = vmatprep.subr.bf16.mxu0 %v501_v0  ;;  %v21_v2 = vld [vmem:[%s690_s0] sm:$0xff]  ;;  %v22_v3 = vld [vmem:[%s690_s0 + $0x8] sm:$0xff]  ;;  %v24_v6 = vld [vmem:[%s690_s0 + $0x18] sm:$0xff] }
   0x3   :  { %458 = vmatpush3.bf16.msra.mxu0 %v501_v0  ;;  %v37_v4 = vpack.c.bf16 %v22_v3, %v21_v2  ;;  %v25_v7 = vld [vmem:[%s690_s0 + $0x20] sm:$0xff]  ;;  %v26_v8 = vld [vmem:[%s690_s0 + $0x28] sm:$0xff]  ;;  %v38_v9 = vpack.c.bf16 %v24_v6, %v23_v5  ;;  %v503_v11 = vld [vmem:[%s691_s3 + $0x18] sm:$0xff]  }
   0x4   :  { %459 = vmatprep.subr.bf16.mxu0 %v502_v1  ;;  %v39_v10 = vpack.c.bf16 %v26_v8, %v25_v7  ;;  %477 = vmatprep.subr.bf16.mxu1 %v503_v11  ;;  %v27_v12 = vld [vmem:[%s690_s0 + $0x30] sm:$0xff]  ;;  %v28_v13 = vld [vmem:[%s690_s0 + $0x38] sm:$0xff]  ;;  %v29_v14 = vld [vmem:[%s690_s0 + $0x40] sm:$0xff] }
   0x5   :  { %461 = vmatprep.mubr.msk.bf16.mxu0 %vm68_vm0, %v37_v4  ;;  %478 = vmatpush3.bf16.msra.mxu1 %v503_v11  ;;  %v30_v15 = vld [vmem:[%s690_s0 + $0x48] sm:$0xff]  ;;  %v40_v16 = vpack.c.bf16 %v28_v13, %v27_v12  ;;  %v31_v18 = vld [vmem:[%s690_s0 + $0x50] sm:$0xff]  ;;  %v32_v19 = vld [vmem:[%s690_s0 + $0x58] sm:$0xff] }
   0x6   :  { %v41_v17 = vpack.c.bf16 %v30_v15, %v29_v14  ;;  %v33_v20 = vld [vmem:[%s690_s0 + $0x60] sm:$0xff]  ;;  %v34_v21 = vld [vmem:[%s690_s0 + $0x68] sm:$0xff]  ;;  %v42_v22 = vpack.c.bf16 %v32_v19, %v31_v18  ;;  %v35_v24 = vld [vmem:[%s690_s0 + $0x70] sm:$0xff] }
   0x7   :  { %460 = vmatpush3.bf16.msra.mxu0 %v502_v1  ;;  %v43_v23 = vpack.c.bf16 %v34_v21, %v33_v20  ;;  %v36_v25 = vld [vmem:[%s690_s0 + $0x78] sm:$0xff]  ;;  %v504_v27 = vld [vmem:[%s691_s3 + $0x10] sm:$0xff]   ;;  %v505_v28 = vld [vmem:[%s691_s3 + $0x8] sm:$0xff]  }
   0x8   :  { %v44_v26 = vpack.c.bf16 %v36_v25, %v35_v24  ;;  %479 = vmatprep.subr.bf16.mxu1 %v504_v27  ;;  %v506_v29 = vld [vmem:[%s691_s3] sm:$0xff]  }
   0x9   :  { %480 = vmatpush3.bf16.msra.mxu1 %v504_v27  ;;  %v411_v32 = vld [vmem:[%s692_s2] ss:$0 sm:$0xff] }
   0xa   :  { %462 = vmatmul.mubr.msk.bf16.vlgmr.msra.gmra.mxu0 %vm68_vm0, %v38_v9  ;;  %481 = vmatprep.subr.bf16.mxu1 %v505_v28 }
   0xb   :  { %465 = vmatprep.mubr.msk.bf16.mxu0 %vm68_vm0, %v39_v10 }
   0xd   :  { %482 = vmatpush3.bf16.msra.mxu1 %v505_v28 }
   0xe   :  { %483 = vmatprep.subr.bf16.mxu1 %v506_v29 }
  0x11   :  { %484 = vmatpush3.bf16.msra.mxu1 %v506_v29 }
  0x12   :  { %466 = vmatmul.mubr.msk.bf16.gmra.mxu0 %vm68_vm0, %v40_v16 }
  0x13   :  { %469 = vmatprep.mubr.msk.bf16.mxu0 %vm68_vm0, %v41_v17 }
  0x1a   :  { %470 = vmatmul.mubr.msk.bf16.gmra.mxu0 %vm68_vm0, %v42_v22 }
  0x1b   :  { %473 = vmatprep.mubr.msk.bf16.mxu0 %vm68_vm0, %v43_v23  ;;  %v422_v23 = vld [vmem:[%s693_s4] ss:$0 sm:$0xff] }
  0x22   :  { %474 = vmatmul.mubr.msk.bf16.gmra.mxu0 %vm68_vm0, %v44_v26 }
  0xca   :  { %v463_v30 = vpop.f32.mrf.mxu0 }
  0xcb   :  { %v136_v36 = vadd.f32 %v463_v30, %v411_v32 }
  0xcc   :  { %v127_v31 = vpop.f32.mrf.mxu0 }
  0xcd   :  { %v128_v34 = vadd.f32 %v411_v32, %v127_v31  ;;  %v192_v43 = vmax.f32 %v136_v36, 0.0 }
  0xce   :  { %v464_v33 = vpop.f32.mrf.mxu0 }
  0xcf   :  { %v139_v35 = vadd.f32 %v464_v33, %v411_v32  ;;  %v190_v41 = vmax.f32 %v128_v34, 0.0 }
  0xd0   :  { %v130_v37 = vpop.f32.mrf.mxu0 }
  0xd1   :  { %v131_v38 = vadd.f32 %v411_v32, %v130_v37  ;;  %v193_v39 = vmax.f32 %v139_v35, 0.0 }
  0xd2   :  { %v467_v40 = vpop.f32.mrf.mxu0 }
  0xd3   :  { %v191_v42 = vmax.f32 %v131_v38, 0.0  ;;  %v207_v46 = vpack.c.bf16 %v193_v39, %v192_v43  ;;  %v152_v50 = vadd.f32 %v467_v40, %v411_v32 }
  0xd4   :  { %v143_v44 = vpop.f32.mrf.mxu0 }
  0xd5   :  { %v206_v45 = vpack.c.bf16 %v191_v42, %v190_v41  ;;  %v144_v48 = vadd.f32 %v411_v32, %v143_v44  ;;  %v196_v57 = vmax.f32 %v152_v50, 0.0 }
  0xd6   :  { %v468_v47 = vpop.f32.mrf.mxu0 }
  0xd7   :  { %v155_v49 = vadd.f32 %v468_v47, %v411_v32  ;;  %485 = vmatprep.mubr.msk.bf16.mxu1 %vm253_vm1, %v206_v45  ;;  %v194_v55 = vmax.f32 %v144_v48, 0.0 }
  0xd8   :  { %v146_v51 = vpop.f32.mrf.mxu0  ;;  %486 = vmatmul.mubr.msk.bf16.vlgmr.msra.gmra.mxu1 %vm253_vm1, %v207_v46 }
  0xd9   :  { %v147_v52 = vadd.f32 %v411_v32, %v146_v51  ;;  %v197_v53 = vmax.f32 %v155_v49, 0.0 }
  0xda   :  { %v471_v54 = vpop.f32.mrf.mxu0 }
  0xdb   :  { %v195_v56 = vmax.f32 %v147_v52, 0.0  ;;  %v209_v60 = vpack.c.bf16 %v197_v53, %v196_v57  ;;  %v168_v0 = vadd.f32 %v471_v54, %v411_v32 }
  0xdc   :  { %v159_v58 = vpop.f32.mrf.mxu0 }
  0xdd   :  { %v208_v59 = vpack.c.bf16 %v195_v56, %v194_v55  ;;  %v160_v62 = vadd.f32 %v411_v32, %v159_v58  ;;  %v200_v7 = vmax.f32 %v168_v0, 0.0 }
  0xde   :  { %v472_v61 = vpop.f32.mrf.mxu0 }
  0xdf   :  { %v171_v63 = vadd.f32 %v472_v61, %v411_v32  ;;  %489 = vmatprep.mubr.msk.bf16.mxu1 %vm253_vm1, %v208_v59  ;;  %v198_v5 = vmax.f32 %v160_v62, 0.0 }
  0xe0   :  { %v162_v1 = vpop.f32.mrf.mxu0  ;;  %490 = vmatmul.mubr.msk.bf16.gmra.mxu1 %vm253_vm1, %v209_v60 }
  0xe1   :  { %v163_v2 = vadd.f32 %v411_v32, %v162_v1  ;;  %v201_v3 = vmax.f32 %v171_v63, 0.0 }
  0xe2   :  { %v475_v4 = vpop.f32.mrf.mxu0 }
  0xe3   :  { %v199_v6 = vmax.f32 %v163_v2, 0.0  ;;  %v211_v10 = vpack.c.bf16 %v201_v3, %v200_v7  ;;  %v184_v14 = vadd.f32 %v475_v4, %v411_v32 }
  0xe4   :  { %v175_v8 = vpop.f32.mrf.mxu0 }
  0xe5   :  { %v210_v9 = vpack.c.bf16 %v199_v6, %v198_v5  ;;  %v176_v12 = vadd.f32 %v411_v32, %v175_v8  ;;  %v204_v20 = vmax.f32 %v184_v14, 0.0 }
  0xe6   :  { %v476_v11 = vpop.f32.mrf.mxu0 }
  0xe7   :  { %v187_v13 = vadd.f32 %v476_v11, %v411_v32  ;;  %493 = vmatprep.mubr.msk.bf16.mxu1 %vm253_vm1, %v210_v9  ;;  %v202_v18 = vmax.f32 %v176_v12, 0.0 }
  0xe8   :  { %v178_v15 = vpop.f32.mrf.mxu0  ;;  %494 = vmatmul.mubr.msk.bf16.gmra.mxu1 %vm253_vm1, %v211_v10 }
  0xe9   :  { %v179_v16 = vadd.f32 %v411_v32, %v178_v15  ;;  %v205_v17 = vmax.f32 %v187_v13, 0.0 }
  0xeb   :  { %v203_v19 = vmax.f32 %v179_v16, 0.0  ;;  %v213_v22 = vpack.c.bf16 %v205_v17, %v204_v20 }
  0xed   :  { %v212_v21 = vpack.c.bf16 %v203_v19, %v202_v18 }
  0xef   :  { %497 = vmatprep.mubr.msk.bf16.mxu1 %vm253_vm1, %v212_v21 }
  0xf0   :  { %498 = vmatmul.mubr.msk.bf16.gmra.mxu1 %vm253_vm1, %v213_v22 }
 0x198   :  { %v487_v24 = vpop.f32.mrf.mxu1 }
 0x199   :  { %v321_v25 = vadd.f32 %v487_v24, %v422_v23 }
 0x19a   :  { %v312_v26 = vpop.f32.mrf.mxu1 }
 0x19b   :  { %v377_v27 = vmax.f32 %v321_v25, 0.0  ;;  %v313_v28 = vadd.f32 %v422_v23, %v312_v26 }
 0x19c   :  { %v488_v29 = vpop.f32.mrf.mxu1 }
 0x19d   :  { %393 = vst.msk [vmem:[%s694_s5 + $0x10] sm:$0xff] %vm68_vm0, %v377_v27  ;;  %v375_v30 = vmax.f32 %v313_v28, 0.0  ;;  %v324_v31 = vadd.f32 %v488_v29, %v422_v23 }
 0x19e   :  { %v315_v32 = vpop.f32.mrf.mxu1 }
 0x19f   :  { %391 = vst.msk [vmem:[%s694_s5] sm:$0xff] %vm68_vm0, %v375_v30  ;;  %v378_v33 = vmax.f32 %v324_v31, 0.0  ;;  %v316_v34 = vadd.f32 %v422_v23, %v315_v32 }
 0x1a0   :  { %v491_v35 = vpop.f32.mrf.mxu1 }
 0x1a1   :  { %394 = vst.msk [vmem:[%s694_s5 + $0x18] sm:$0xff] %vm68_vm0, %v378_v33  ;;  %v376_v36 = vmax.f32 %v316_v34, 0.0  ;;  %v337_v37 = vadd.f32 %v491_v35, %v422_v23 }
 0x1a2   :  { %v328_v38 = vpop.f32.mrf.mxu1 }
 0x1a3   :  { %392 = vst.msk [vmem:[%s694_s5 + $0x8] sm:$0xff] %vm68_vm0, %v376_v36  ;;  %v381_v39 = vmax.f32 %v337_v37, 0.0  ;;  %v329_v40 = vadd.f32 %v422_v23, %v328_v38 }
 0x1a4   :  { %v492_v41 = vpop.f32.mrf.mxu1 }
 0x1a5   :  { %397 = vst.msk [vmem:[%s694_s5 + $0x30] sm:$0xff] %vm68_vm0, %v381_v39  ;;  %v379_v42 = vmax.f32 %v329_v40, 0.0  ;;  %v340_v43 = vadd.f32 %v492_v41, %v422_v23 }
 0x1a6   :  { %v331_v44 = vpop.f32.mrf.mxu1 }
 0x1a7   :  { %395 = vst.msk [vmem:[%s694_s5 + $0x20] sm:$0xff] %vm68_vm0, %v379_v42  ;;  %v382_v45 = vmax.f32 %v340_v43, 0.0  ;;  %v332_v46 = vadd.f32 %v422_v23, %v331_v44 }
 0x1a8   :  { %v495_v47 = vpop.f32.mrf.mxu1 }
 0x1a9   :  { %398 = vst.msk [vmem:[%s694_s5 + $0x38] sm:$0xff] %vm68_vm0, %v382_v45  ;;  %v380_v48 = vmax.f32 %v332_v46, 0.0  ;;  %v353_v49 = vadd.f32 %v495_v47, %v422_v23 }
 0x1aa   :  { %v344_v50 = vpop.f32.mrf.mxu1 }
 0x1ab   :  { %396 = vst.msk [vmem:[%s694_s5 + $0x28] sm:$0xff] %vm68_vm0, %v380_v48  ;;  %v385_v51 = vmax.f32 %v353_v49, 0.0  ;;  %v345_v52 = vadd.f32 %v422_v23, %v344_v50 }
 0x1ac   :  { %v496_v53 = vpop.f32.mrf.mxu1 }
 0x1ad   :  { %401 = vst.msk [vmem:[%s694_s5 + $0x50] sm:$0xff] %vm68_vm0, %v385_v51  ;;  %v383_v54 = vmax.f32 %v345_v52, 0.0  ;;  %v356_v55 = vadd.f32 %v496_v53, %v422_v23 }
 0x1ae   :  { %v347_v56 = vpop.f32.mrf.mxu1 }
 0x1af   :  { %399 = vst.msk [vmem:[%s694_s5 + $0x40] sm:$0xff] %vm68_vm0, %v383_v54  ;;  %v386_v57 = vmax.f32 %v356_v55, 0.0  ;;  %v348_v58 = vadd.f32 %v422_v23, %v347_v56 }
 0x1b0   :  { %v499_v59 = vpop.f32.mrf.mxu1 }
 0x1b1   :  { %402 = vst.msk [vmem:[%s694_s5 + $0x58] sm:$0xff] %vm68_vm0, %v386_v57  ;;  %v384_v60 = vmax.f32 %v348_v58, 0.0  ;;  %v369_v61 = vadd.f32 %v499_v59, %v422_v23 }
 0x1b2   :  { %v360_v62 = vpop.f32.mrf.mxu1 }
 0x1b3   :  { %400 = vst.msk [vmem:[%s694_s5 + $0x48] sm:$0xff] %vm68_vm0, %v384_v60  ;;  %v389_v63 = vmax.f32 %v369_v61, 0.0  ;;  %v361_v0 = vadd.f32 %v422_v23, %v360_v62 }
 0x1b4   :  { %v500_v1 = vpop.f32.mrf.mxu1 }
 0x1b5   :  { %405 = vst.msk [vmem:[%s694_s5 + $0x70] sm:$0xff] %vm68_vm0, %v389_v63  ;;  %v387_v2 = vmax.f32 %v361_v0, 0.0  ;;  %v372_v3 = vadd.f32 %v500_v1, %v422_v23 }
 0x1b6   :  { %v363_v4 = vpop.f32.mrf.mxu1 }
 0x1b7   :  { %403 = vst.msk [vmem:[%s694_s5 + $0x60] sm:$0xff] %vm68_vm0, %v387_v2  ;;  %v390_v5 = vmax.f32 %v372_v3, 0.0  ;;  %v364_v6 = vadd.f32 %v422_v23, %v363_v4 }
 0x1b9   :  { %406 = vst.msk [vmem:[%s694_s5 + $0x78] sm:$0xff] %vm68_vm0, %v390_v5  ;;  %v388_v7 = vmax.f32 %v364_v6, 0.0 }
 0x1bb   :  { %404 = vst.msk [vmem:[%s694_s5 + $0x68] sm:$0xff] %vm68_vm0, %v388_v7 }

</bundles_post_ra>
